<compile_context>
chip_gen: v6e
topology: v6e:2x2x1
jax: 0.10.0
libtpu: 0.0.40
codegen_flags: <defaults>
</compile_context>

<pallas_src>
import functools

import jax
import jax.numpy as jnp
from jax.experimental import pallas as pl
from jax.experimental.pallas import tpu as pltpu


def _focal_loss_kernel(x_ref, tgt_ref, loss_ref, acc_ref, *,
                       alpha, gamma, tile_b, total_b):
    i = pl.program_id(0)

    @pl.when(i == 0)
    def _():
        acc_ref[...] = jnp.zeros_like(acc_ref)

    x = x_ref[...].astype(jnp.float32)            # (TILE_B, C), cast after load
    tgt = tgt_ref[...]                            # (TILE_B, 1) int32
    tb, c = x.shape

    # one-hot(target) via class-index iota compare (scatter_ equivalent).
    cls_ids = jax.lax.broadcasted_iota(jnp.int32, (tb, c), dimension=1)
    one_hot = (cls_ids == tgt).astype(jnp.float32)

    # Select the target probability first: the only class-wide work is
    # iota / compare / multiply / lane-reduce (VPU + XLU, hidden under DMA).
    p_t = jnp.sum(one_hot * x, axis=1, keepdims=True) + 1e-6   # (TILE_B, 1)

    # Mask rows that only exist because of batch padding.
    row_ids = jax.lax.broadcasted_iota(jnp.int32, (tb, 1), dimension=0) + i * tile_b
    valid = row_ids < total_b
    p_safe = jnp.where(valid, p_t, 1.0)           # padded rows -> log(1) = 0

    one_minus = 1.0 - p_safe
    if float(gamma) == 2.0:
        weight = one_minus * one_minus            # VPU square, no EUP pow
    else:
        # Clamp base >= 0 so non-integer gamma can't produce NaN when p > 1.
        weight = jnp.power(jnp.maximum(one_minus, 0.0), jnp.float32(gamma))

    focal = (-alpha) * weight * jnp.log(p_safe)   # narrow (TILE_B, 1) EUP work
    focal = jnp.where(valid, focal, 0.0)

    acc_ref[...] += jnp.sum(focal, axis=0, keepdims=True)      # (1, 1)

    @pl.when(i == pl.num_programs(0) - 1)
    def _():
        # reduction == 'mean': divide by the true (unpadded) batch size.
        loss_ref[...] = acc_ref[...] * jnp.float32(1.0 / total_b)


def focal_loss(output, target, *, alpha=1.0, gamma=2.0, max_tile_b=1024):
    """output: (B, C) float (any float dtype); target: (B,) int.

    Returns the scalar mean focal loss (f32).
    """
    B, C = output.shape
    tgt2d = target.astype(jnp.int32).reshape(B, 1)

    # Pick the largest batch tile (multiple of 8) whose double-buffered input
    # block stays around ~4 MiB -> fits every generation's default scoped VMEM.
    itemsize = jnp.dtype(output.dtype).itemsize
    bytes_per_row = max(1, C * itemsize)
    budget_rows = (4 * 1024 * 1024) // bytes_per_row
    tile_b = max(8, min(int(max_tile_b), (budget_rows // 8) * 8))
    b_rounded = ((B + 7) // 8) * 8
    tile_b = min(tile_b, b_rounded)

    num_tiles = pl.cdiv(B, tile_b)
    b_pad = num_tiles * tile_b
    if b_pad != B:
        output = jnp.pad(output, ((0, b_pad - B), (0, 0)))
        tgt2d = jnp.pad(tgt2d, ((0, b_pad - B), (0, 0)))

    kernel = functools.partial(
        _focal_loss_kernel,
        alpha=float(alpha), gamma=float(gamma), tile_b=tile_b, total_b=B,
    )
    loss = pl.pallas_call(
        kernel,
        out_shape=jax.ShapeDtypeStruct((1, 1), jnp.float32),
        grid_spec=pltpu.PrefetchScalarGridSpec(
            num_scalar_prefetch=0,
            grid=(num_tiles,),
            in_specs=[
                pl.BlockSpec((tile_b, C), lambda i: (i, 0)),
                pl.BlockSpec((tile_b, 1), lambda i: (i, 0)),
            ],
            out_specs=pl.BlockSpec((1, 1), lambda i: (0, 0)),
            scratch_shapes=[pltpu.VMEM((1, 1), jnp.float32)],
        ),
        compiler_params=pltpu.CompilerParams(
            dimension_semantics=("arbitrary",),   # reduction into resident acc
        ),
    )(output, tgt2d)
    return loss[0, 0]


def focal_loss_ref(output, target, *, alpha=1.0, gamma=2.0):
    x = output.astype(jnp.float32) + 1e-6
    _, C = output.shape
    one_hot = jax.nn.one_hot(target, C, dtype=jnp.float32)
    focal = -alpha * jnp.power(1.0 - x, gamma) * jnp.log(x)
    return jnp.mean(jnp.sum(one_hot * focal, axis=1))


if __name__ == "__main__":
    key = jax.random.PRNGKey(0)

    # Case 1: small, single-tile.
    B, C = 8, 16
    k1, k2, k3, k4 = jax.random.split(key, 4)
    logits = jax.random.normal(k1, (B, C), dtype=jnp.float32)
    output = jax.nn.softmax(logits, axis=-1)        # probabilities in (0, 1)
    target = jax.random.randint(k2, (B,), 0, C, dtype=jnp.int32)

    loss = jax.block_until_ready(focal_loss(output, target, alpha=1.0, gamma=2.0))
    ref = focal_loss_ref(output, target, alpha=1.0, gamma=2.0)
    assert jnp.allclose(loss, ref, rtol=1e-5, atol=1e-6), (loss, ref)

    # Case 2: non-multiple batch + forced multi-tile grid (exercises the
    # accumulator across grid steps and the padded-row mask).
    B2, C2 = 20, 24
    logits2 = jax.random.normal(k3, (B2, C2), dtype=jnp.float32)
    output2 = jax.nn.softmax(logits2, axis=-1)
    target2 = jax.random.randint(k4, (B2,), 0, C2, dtype=jnp.int32)

    loss2 = jax.block_until_ready(
        focal_loss(output2, target2, alpha=1.0, gamma=2.0, max_tile_b=8))
    ref2 = focal_loss_ref(output2, target2, alpha=1.0, gamma=2.0)
    assert jnp.allclose(loss2, ref2, rtol=1e-5, atol=1e-6), (loss2, ref2)

    print("KERNEL_OK")
</pallas_src>

<mosaic_0001>
module attributes {stable_mosaic.version = 11 : i64} {
  func.func @_focal_loss_kernel(%arg0: i32, %arg1: memref<8x16xf32, #tpu.memory_space<vmem>>, %arg2: memref<8x1xi32, #tpu.memory_space<vmem>>, %arg3: memref<1x1xf32, #tpu.memory_space<vmem>>, %arg4: memref<1x1xf32, #tpu.memory_space<vmem>>) attributes {dimension_semantics = [#tpu.dimension_semantics<arbitrary>], iteration_bounds = array<i64: 1>, scalar_prefetch = 0 : i64, scratch_operands = 1 : i64, tpu.core_type = #tpu.core_type<tc>, window_params = [{transform_indices = @transform_0, window_bounds = array<i64: 8, 16>}, {transform_indices = @transform_1, window_bounds = array<i64: 8, 1>}, {pipeline_mode = #tpu.pipeline_mode<synchronous>, transform_indices = @transform_2, window_bounds = array<i64: 1, 1>}]} {
    %c0_i32 = arith.constant 0 : i32
    %0 = arith.cmpi eq, %arg0, %c0_i32 : i32
    %1 = arith.extui %0 : i1 to i32
    %c0_i32_0 = arith.constant 0 : i32
    %2 = arith.cmpi ne, %1, %c0_i32_0 : i32
    scf.if %2 {
      %cst_17 = arith.constant 0.000000e+00 : f32
      %40 = vector.broadcast %cst_17 : f32 to vector<1x1xf32>
      %c0_18 = arith.constant 0 : index
      %c0_19 = arith.constant 0 : index
      %41 = vector.load %arg4[%c0_18, %c0_19] : memref<1x1xf32, #tpu.memory_space<vmem>>, vector<1x1xf32>
      tpu.vector_store %arg4[%c0_18, %c0_19], %40 {strides = array<i32>} : memref<1x1xf32, #tpu.memory_space<vmem>>, vector<1x1xf32>,
    } else {
    }
    %c0 = arith.constant 0 : index
    %c0_1 = arith.constant 0 : index
    %3 = vector.load %arg1[%c0, %c0_1] : memref<8x16xf32, #tpu.memory_space<vmem>>, vector<8x16xf32>
    %c0_2 = arith.constant 0 : index
    %c0_3 = arith.constant 0 : index
    %4 = vector.load %arg2[%c0_2, %c0_3] : memref<8x1xi32, #tpu.memory_space<vmem>>, vector<8x1xi32>
    %5 = tpu.iota {dimensions = array<i32: 1>} : vector<8x16xi32>
    %6 = vector.broadcast %4 : vector<8x1xi32> to vector<8x16xi32>
    %7 = arith.cmpi eq, %5, %6 : vector<8x16xi32>
    %8 = arith.extui %7 : vector<8x16xi1> to vector<8x16xi32>
    %9 = arith.sitofp %8 : vector<8x16xi32> to vector<8x16xf32>
    %10 = arith.mulf %9, %3 : vector<8x16xf32>
    %cst = arith.constant dense<0.000000e+00> : vector<8xf32>
    %11 = vector.multi_reduction <add>, %10, %cst [1] : vector<8x16xf32> to vector<8xf32>
    %12 = vector.shape_cast %11 : vector<8xf32> to vector<8x1xf32>
    %cst_4 = arith.constant 9.99999997E-7 : f32
    %13 = vector.broadcast %cst_4 : f32 to vector<8x1xf32>
    %14 = arith.addf %12, %13 : vector<8x1xf32>
    %15 = tpu.iota {dimensions = array<i32: 0>} : vector<8x1xi32>
    %c8_i32 = arith.constant 8 : i32
    %16 = arith.muli %arg0, %c8_i32 : i32
    %17 = vector.broadcast %16 : i32 to vector<8x1xi32>
    %18 = arith.addi %15, %17 : vector<8x1xi32>
    %c8_i32_5 = arith.constant 8 : i32
    %19 = vector.broadcast %c8_i32_5 : i32 to vector<8x1xi32>
    %20 = arith.cmpi slt, %18, %19 : vector<8x1xi32>
    %cst_6 = arith.constant 1.000000e+00 : f32
    %21 = vector.broadcast %cst_6 : f32 to vector<8x1xf32>
    %22 = arith.select %20, %14, %21 : vector<8x1xi1>, vector<8x1xf32>
    %cst_7 = arith.constant 1.000000e+00 : f32
    %23 = vector.broadcast %cst_7 : f32 to vector<8x1xf32>
    %24 = arith.subf %23, %22 : vector<8x1xf32>
    %25 = arith.mulf %24, %24 : vector<8x1xf32>
    %cst_8 = arith.constant -1.000000e+00 : f32
    %26 = vector.broadcast %cst_8 : f32 to vector<8x1xf32>
    %27 = arith.mulf %26, %25 : vector<8x1xf32>
    %28 = math.log %22 : vector<8x1xf32>
    %29 = arith.mulf %27, %28 : vector<8x1xf32>
    %cst_9 = arith.constant 0.000000e+00 : f32
    %30 = vector.broadcast %cst_9 : f32 to vector<8x1xf32>
    %31 = arith.select %20, %29, %30 : vector<8x1xi1>, vector<8x1xf32>
    %c0_10 = arith.constant 0 : index
    %c0_11 = arith.constant 0 : index
    %32 = vector.load %arg4[%c0_10, %c0_11] : memref<1x1xf32, #tpu.memory_space<vmem>>, vector<1x1xf32>
    %cst_12 = arith.constant dense<0.000000e+00> : vector<1xf32>
    %33 = vector.multi_reduction <add>, %31, %cst_12 [0] : vector<8x1xf32> to vector<1xf32>
    %34 = vector.shape_cast %33 : vector<1xf32> to vector<1x1xf32>
    %35 = arith.addf %32, %34 : vector<1x1xf32>
    %c0_13 = arith.constant 0 : index
    %c0_14 = arith.constant 0 : index
    %36 = vector.load %arg4[%c0_13, %c0_14] : memref<1x1xf32, #tpu.memory_space<vmem>>, vector<1x1xf32>
    tpu.vector_store %arg4[%c0_13, %c0_14], %35 {strides = array<i32>} : memref<1x1xf32, #tpu.memory_space<vmem>>, vector<1x1xf32>,
    %c0_i32_15 = arith.constant 0 : i32
    %37 = arith.cmpi eq, %arg0, %c0_i32_15 : i32
    %38 = arith.extui %37 : i1 to i32
    %c0_i32_16 = arith.constant 0 : i32
    %39 = arith.cmpi ne, %38, %c0_i32_16 : i32
    scf.if %39 {
      %c0_17 = arith.constant 0 : index
      %c0_18 = arith.constant 0 : index
      %40 = vector.load %arg4[%c0_17, %c0_18] : memref<1x1xf32, #tpu.memory_space<vmem>>, vector<1x1xf32>
      %cst_19 = arith.constant 1.250000e-01 : f32
      %41 = vector.broadcast %cst_19 : f32 to vector<1x1xf32>
      %42 = arith.mulf %40, %41 : vector<1x1xf32>
      %c0_20 = arith.constant 0 : index
      %c0_21 = arith.constant 0 : index
      %43 = vector.load %arg3[%c0_20, %c0_21] : memref<1x1xf32, #tpu.memory_space<vmem>>, vector<1x1xf32>
      tpu.vector_store %arg3[%c0_20, %c0_21], %42 {strides = array<i32>} : memref<1x1xf32, #tpu.memory_space<vmem>>, vector<1x1xf32>,
    } else {
    }
    return
  }
  func.func @transform_0(%arg0: i32) -> (i32, i32) {
    %c0_i32 = arith.constant 0 : i32
    %c0_i32_0 = arith.constant 0 : i32
    return %arg0, %c0_i32 : i32, i32
  }
  func.func @transform_1(%arg0: i32) -> (i32, i32) {
    %c0_i32 = arith.constant 0 : i32
    %c0_i32_0 = arith.constant 0 : i32
    return %arg0, %c0_i32 : i32, i32
  }
  func.func @transform_2(%arg0: i32) -> (i32, i32) {
    %c0_i32 = arith.constant 0 : i32
    %c0_i32_0 = arith.constant 0 : i32
    %c0_i32_1 = arith.constant 0 : i32
    return %c0_i32, %c0_i32_0 : i32, i32
  }
}

</mosaic_0001>

<bundles_post_ra>
// kernel: tpu_custom_call.1
= control target key start
LH: loop header
LB: loop body
LE: loop exit
PB: predicated region body
PF: predicated region fallthrough
CT: control target
= control target key end

     0   :  { %vm16_vm0 = vcmask 0   ;;  %v107_v1 = vmov 0   ;;  %v108_v2 = vmov 0.0   ;;  %s137_s0 = inlined_call_operand.vmem [shape: f32[8,16], index: 0, kind: input, shape index: {}]   ;;  %s138_s1 = inlined_call_operand.vmem [shape: s32[8,1], index: 1, kind: input, shape index: {}]   ;;  %s139_s2 = inlined_call_operand.hbm [shape: f32[1,1], index: 2, kind: output, shape index: {}]  }
   0x1   :  { %v19_v0 = vld [vmem:[%s138_s1] sm:$0xff]  ;;  %82 = vset.pattern.permute.xlu0 %v107_v1  ;;  %17 = vst.msk [vmem:[#allocation2] sm:$0x1] %vm16_vm0, %v108_v2 }
   0x2   :  { %7 = vsyncpa [#allocation4], 0  ;;  %23 = vperm.xlu0 %82, %v19_v0   ;;  %v20_v3 = vlaneseq  ;;  %v18_v6 = vld [vmem:[%s137_s0] sm:$0xff]  ;;  %vm29_vm2 = vcmask 130048   ;;  %s109_s0 = smov [#allocation3]  }
   0x3   :  { %s70_s1 = sshll.u32 %s109_s0, 4  ;;  %s71_s1 = int_to_ptr.vmem [resolvable:$true] %s70_s1 }
   0x4   :  { %v21_v4 = vand.u32 127, %v20_v3  ;;  %s85_s13 = scalar_lea.vmem %s71_s1, 16  ;;  %s89_s14 = scalar_lea.vmem %s71_s1, 32 }
   0x5   :  { %p86_p0 = scmp.ne.s32.totalorder %s71_s1, %s85_s13  ;;  %p90_p1 = scmp.lt.s32.totalorder %s71_s1, %s71_s1 }
   0x6   :  { %p91_p2 = scmp.lt.s32.totalorder %s89_s14, %s85_s13 }
   0x8   :  { %v48_v23 = vld [vmem:[#allocation2] sm:$0x1]  ;;  %p92_p3 = por %p91_p2, %p90_p1 }
   0xa   :  { %p93_p4 = pnand %p92_p3, %p86_p0 }
  0x7d   :  { %v24_v5 = vpop.permute.xlu0 %23 }
  0x7e   :  { %vm25_vm1 = vcmp.eq.s32.totalorder %v21_v4, %v24_v5 }
  0x7f   :  { %v78_v7 = vsel %vm25_vm1, 1.0, %v108_v2 }
  0x80   :  { %v28_v8 = vmul.f32 %v78_v7, %v18_v6 }
  0x82   :  { %v30_v9 = vsel %vm29_vm2, %v28_v8, 0.0 }
  0x83   :  { %31 = vadd.xlane.f32.xlu0 %v30_v9 }
 0x10c   :  { %v32_v10 = vpop.xlane.xlu0 %31 }
 0x10d   :  { %v33_v11 = vadd.f32 1e-06, %v32_v10 }
 0x10f   :  { %83 = vlog2.f32 %v33_v11  ;;  %v41_v12 = vsub.f32 1.0, %v33_v11 }
 0x111   :  { %v42_v13 = vmul.f32 %v41_v12, %v41_v12 }
 0x113   :  { %v43_v15 = vmul.f32 -1.0, %v42_v13 }
 0x11c   :  { %v84_v14 = vpop.eup %83 }
 0x11d   :  { %v45_v16 = vmul.f32 0.6931472, %v84_v14 }
 0x11f   :  { %v46_v17 = vmul.f32 %v45_v16, %v43_v15 }
 0x121   :  { %v49_v18 = vrot.slane %v46_v17, 4 }
 0x123   :  { %v50_v19 = vadd.f32 %v49_v18, %v46_v17 }
 0x125   :  { %v51_v20 = vrot.slane %v50_v19, 2 }
 0x127   :  { %v52_v21 = vadd.f32 %v51_v20, %v50_v19 }
 0x129   :  { %v53_v22 = vrot.slane %v52_v21, 1 }
 0x12b   :  { %v54_v24 = vadd.f32 %v53_v22, %v52_v21 }
 0x12d   :  { %v55_v25 = vadd.f32 %v54_v24, %v48_v23 }
 0x12f   :  { %57 = vst.msk [vmem:[#allocation2] sm:$0x1] %vm16_vm0, %v55_v25 }
 0x136   :  { %v61_v26 = vld [vmem:[#allocation2] sm:$0x1] }
 0x137   :  { %v62_v27 = vmul.f32 0.125, %v61_v26 }
 0x139   :  { %63 = vst.msk [vmem:[#allocation3] sm:$0x1] %vm16_vm0, %v62_v27 }
 0x13a   :  { %96 = shalt.err (!%p93_p4)
}
 0x13b   :  { %73 = dma.vmem_to_hbm [thread:$0]  %s71_s1, 16, %s139_s2, [#allocation4]  }
 0x13c   :  { %105 = dma.done.wait [#allocation4], 16  }
 0x13d   :  { %106 = vsyncadd [#allocation4], 4294967280 }
 0x13e   :  { %77 = vsyncpa [#allocation4], 1 }

</bundles_post_ra>
